<compile_context>
chip_gen: v6e
topology: v6e:2x2x1
jax: 0.10.0
libtpu: 0.0.40
codegen_flags: <defaults>
</compile_context>

<pallas_src>
import jax
import jax.numpy as jnp
from jax.experimental import pallas as pl
from jax.experimental.pallas import tpu as pltpu


def _gather_kernel(mask_ref, x_ref, o_ref):
    """Vectorized (one-hot MXU) token gather for one batch block.

    mask_ref : VMEM int32 (B, 1, T) -- kept-token indices per batch element
    x_ref    : VMEM (B, L, D)       -- full sequences for this batch block
    o_ref    : VMEM (B, T, D)       -- gathered (kept) tokens
    """
    B, _, T = mask_ref.shape
    L = x_ref.shape[1]

    idx = mask_ref[...][:, 0, :]                               # (B, T) int32
    iota_l = jax.lax.broadcasted_iota(jnp.int32, (B, T, L), 2)  # (B, T, L)
    # Exactly one 1 per (b, t) row -> the matmul gather is bit-exact in any dtype.
    onehot = (iota_l == idx[:, :, None]).astype(x_ref.dtype)    # (B, T, L)

    gathered = jnp.einsum(
        "btl,bld->btd", onehot, x_ref[...],
        preferred_element_type=jnp.float32)                     # MXU, f32 acc
    o_ref[...] = gathered.astype(o_ref.dtype)


def _pick_batch_block(N, L, T, D, itemsize):
    """Largest divisor of N whose double-buffered in/out tiles fit the budget,
    while keeping >= 2 grid steps when possible (v7x 2-TC sharding)."""
    budget = 24 * 1024 * 1024  # conservative: fits default scoped VMEM + headroom
    per_b = 2 * (L * D + T * D) * itemsize + 2 * T * 4  # double-buffered x/out + mask
    cap = max(1, budget // max(1, per_b))
    if N >= 2:
        cap = min(cap, max(1, N // 2))
    return max(b for b in range(1, N + 1) if N % b == 0 and b <= cap)


def _pallas_token_gather(x, mask):
    """x: (N, L, D), mask: (N, T) int32 -> (N, T, D)."""
    N, L, D = x.shape
    T = mask.shape[1]
    b_blk = _pick_batch_block(N, L, T, D, x.dtype.itemsize)
    grid = (N // b_blk,)

    # Shape mask (N, 1, T): last two block dims equal the full array dims, so the
    # (8, 128) tiling constraint never triggers regardless of b_blk.
    mask3 = mask.reshape(N, 1, T).astype(jnp.int32)

    return pl.pallas_call(
        _gather_kernel,
        out_shape=jax.ShapeDtypeStruct((N, T, D), x.dtype),
        grid_spec=pltpu.PrefetchScalarGridSpec(
            num_scalar_prefetch=0,
            grid=grid,
            in_specs=[
                pl.BlockSpec((b_blk, 1, T), lambda n: (n, 0, 0)),
                pl.BlockSpec((b_blk, L, D), lambda n: (n, 0, 0)),
            ],
            out_specs=pl.BlockSpec((b_blk, T, D), lambda n: (n, 0, 0)),
        ),
        compiler_params=pltpu.CompilerParams(
            dimension_semantics=("parallel",),
            vmem_limit_bytes=32 * 1024 * 1024,
        ),
    )(mask3, x)


def _random_keep_mask(key, N, L, tokens, token_shuffling):
    """random_mask(): iid uniform -> argsort -> keep first `tokens` -> sort,
    then prepend CLS index 0.  Returns (N, tokens+1) int32."""
    _L = L - 1
    noise = jax.random.uniform(key, (N, _L))
    patch_mask = jnp.argsort(noise, axis=1) + 1          # indices in [1, L-1]
    patch_mask = patch_mask[:, :tokens]
    if not token_shuffling:
        patch_mask = jnp.sort(patch_mask, axis=1)
    cls_mask = jnp.zeros((N, 1), dtype=patch_mask.dtype)  # always keep CLS (idx 0)
    return jnp.concatenate([cls_mask, patch_mask], axis=1).astype(jnp.int32)


def sensed_patch_dropout_forward(
    x,
    key,
    *,
    tokens,
    training=True,
    train_sampling="random",
    inference_sampling="random",
    token_shuffling=False,
):
    """JAX/Pallas equivalent of SensedPatchDropout.forward.

    Matches the PyTorch module: returns only the (possibly token-dropped) x.
    Supports 'oracle' (identity) and 'random' sampling.
    """
    sampling = train_sampling if training else inference_sampling
    if sampling == "oracle":
        return x
    if sampling != "random":
        raise NotImplementedError(
            f"SensedPatchDropout pallas port does not support {sampling} sampling")

    N, L, D = x.shape
    full_mask = _random_keep_mask(key, N, L, tokens, token_shuffling)
    return _pallas_token_gather(x, full_mask)


if __name__ == "__main__":
    # Small shapes: batch=2, 16 patches + 1 CLS token, hidden=32, keep 8 patches.
    N, L, D = 2, 17, 32
    keep_tokens = 8

    key = jax.random.PRNGKey(0)
    kx, kmask = jax.random.split(key)
    x = jax.random.normal(kx, (N, L, D), dtype=jnp.float32)

    out = sensed_patch_dropout_forward(
        x, kmask, tokens=keep_tokens, training=True, train_sampling="random")
    out = jax.block_until_ready(out)

    # Pure-JAX reference for the gather (same deterministic mask construction).
    mask = _random_keep_mask(kmask, N, L, keep_tokens, token_shuffling=False)
    ref = jnp.take_along_axis(
        x, jnp.broadcast_to(mask[..., None], (N, keep_tokens + 1, D)), axis=1)

    assert out.shape == (N, keep_tokens + 1, D), out.shape
    assert out.dtype == x.dtype
    assert jnp.allclose(out, ref), "Pallas gather mismatch vs reference"

    # Oracle path: identity (same return type as the 'random' path: just x).
    oracle = sensed_patch_dropout_forward(
        x, kmask, tokens=keep_tokens, training=True, train_sampling="oracle")
    assert jnp.array_equal(oracle, x)

    print("KERNEL_OK")
</pallas_src>

<mosaic_0001>
module attributes {stable_mosaic.version = 11 : i64} {
  func.func @_gather_kernel(%arg0: i32, %arg1: memref<1x1x9xi32, #tpu.memory_space<vmem>>, %arg2: memref<1x17x32xf32, #tpu.memory_space<vmem>>, %arg3: memref<1x9x32xf32, #tpu.memory_space<vmem>>) attributes {dimension_semantics = [#tpu.dimension_semantics<parallel>], iteration_bounds = array<i64: 2>, scalar_prefetch = 0 : i64, scratch_operands = 0 : i64, tpu.core_type = #tpu.core_type<tc>, window_params = [{transform_indices = @transform_0, window_bounds = array<i64: 1, 1, 9>}, {transform_indices = @transform_1, window_bounds = array<i64: 1, 17, 32>}, {transform_indices = @transform_2, window_bounds = array<i64: 1, 9, 32>}]} {
    %c0 = arith.constant 0 : index
    %c0_0 = arith.constant 0 : index
    %c0_1 = arith.constant 0 : index
    %0 = vector.load %arg1[%c0, %c0_0, %c0_1] : memref<1x1x9xi32, #tpu.memory_space<vmem>>, vector<1x1x9xi32>
    %1 = vector.shape_cast %0 : vector<1x1x9xi32> to vector<1x9xi32>
    %2 = tpu.iota {dimensions = array<i32: 2>} : vector<1x9x17xi32>
    %3 = vector.shape_cast %1 : vector<1x9xi32> to vector<1x9x1xi32>
    %4 = vector.broadcast %3 : vector<1x9x1xi32> to vector<1x9x17xi32>
    %5 = arith.cmpi eq, %2, %4 : vector<1x9x17xi32>
    %6 = arith.extui %5 : vector<1x9x17xi1> to vector<1x9x17xi32>
    %7 = arith.sitofp %6 : vector<1x9x17xi32> to vector<1x9x17xf32>
    %c0_2 = arith.constant 0 : index
    %c0_3 = arith.constant 0 : index
    %c0_4 = arith.constant 0 : index
    %8 = vector.load %arg2[%c0_2, %c0_3, %c0_4] : memref<1x17x32xf32, #tpu.memory_space<vmem>>, vector<1x17x32xf32>
    "tpu.trace_start"() <{level = 10 : i32, message = "btl,bld->btd"}> : () -> ()
    %cst = arith.constant dense<0.000000e+00> : vector<1x9x32xf32>
    %9 = tpu.matmul %7, %8, %cst {dimension_numbers = #tpu.dot_dimension_numbers<[2], [1], [1], [2], [0, 0, 0, 1, 1, 2], [0], [0]>} : vector<1x9x17xf32>, vector<1x17x32xf32>, vector<1x9x32xf32> -> vector<1x9x32xf32>
    "tpu.trace_stop"() : () -> ()
    %c0_5 = arith.constant 0 : index
    %c0_6 = arith.constant 0 : index
    %c0_7 = arith.constant 0 : index
    %10 = vector.load %arg3[%c0_5, %c0_6, %c0_7] : memref<1x9x32xf32, #tpu.memory_space<vmem>>, vector<1x9x32xf32>
    tpu.vector_store %arg3[%c0_5, %c0_6, %c0_7], %9 {strides = array<i32>} : memref<1x9x32xf32, #tpu.memory_space<vmem>>, vector<1x9x32xf32>,
    return
  }
  func.func @transform_0(%arg0: i32) -> (i32, i32, i32) {
    %c0_i32 = arith.constant 0 : i32
    %c0_i32_0 = arith.constant 0 : i32
    %c0_i32_1 = arith.constant 0 : i32
    return %arg0, %c0_i32, %c0_i32_0 : i32, i32, i32
  }
  func.func @transform_1(%arg0: i32) -> (i32, i32, i32) {
    %c0_i32 = arith.constant 0 : i32
    %c0_i32_0 = arith.constant 0 : i32
    %c0_i32_1 = arith.constant 0 : i32
    return %arg0, %c0_i32, %c0_i32_0 : i32, i32, i32
  }
  func.func @transform_2(%arg0: i32) -> (i32, i32, i32) {
    %c0_i32 = arith.constant 0 : i32
    %c0_i32_0 = arith.constant 0 : i32
    %c0_i32_1 = arith.constant 0 : i32
    return %arg0, %c0_i32, %c0_i32_0 : i32, i32, i32
  }
}

</mosaic_0001>

<bundles_post_ra>
// kernel: tpu_custom_call.1
= control target key start
LH: loop header
LB: loop body
LE: loop exit
PB: predicated region body
PF: predicated region fallthrough
CT: control target
= control target key end

     0   :  { %s400_s9 = smov 0   ;;  %s425_s0 = inlined_call_operand.vmem [shape: s32[2,1,9], index: 0, kind: input, shape index: {}]   ;;  %s426_s1 = inlined_call_operand.vmem [shape: f32[2,17,32], index: 1, kind: input, shape index: {}]   ;;  %s427_s2 = inlined_call_operand.vmem [shape: f32[2,9,32], index: 2, kind: output, shape index: {}]  }
   0x1 LB: > { %s335_s10 = sadd.s32 4294967295, %s382_s9   ;;  %p339_p0 = scmp.ge.s32.totalorder %s382_s9, 1  ;;  %s382_s9 = sphi %s400_s9, %s12_s9  }
   0x2   : > { %p120_p1 = scmp.lt.s32.totalorder %s382_s9, 3 }
   0x4   : > { %p121_p2 = pnand %p339_p0, %p120_p1 }
   0x5   : > { %p145_p3 = scmp.lt.s32.totalorder (!%p121_p2), %s335_s10, 1 }
   0x6   : > { %124 = sbr.rel (%p121_p2) target bundleno = 331 (0x14b), region = 28 }
   0xb   : > { %s429_s10 = smov (!%p145_p3, %s335_s10), 1  ;;  %vm188_vm0 = vcmask 1040384   ;;  %v159_v4 = vlaneseq  ;;  %vm181_vm1 = vcmask 138240   ;;  %v384_v7 = vmov 0.0  }
   0xc   : > { %s147_s13 = scalar_lea.vmem %s425_s0, %s429_s10  ;;  %s366_s14 = smul.u32 24, %s429_s10  ;;  %vm269_vm4 = vcmask 253952   ;;  %vm267_vm5 = vcmask 261120  }
   0xd   : > { %v343_v0 = vld [vmem:[%s147_s13] ss:$0 sm:$0xff]  ;;  %v160_v5 = vand.u32 127, %v159_v4  ;;  %s351_s18 = sshll.u32 %s429_s10, 4 }
   0xe   : > { %166 = vbcast.lane.b32.xlu0 %v343_v0, 256  ;;  %s152_s17 = scalar_lea.vmem %s426_s1, %s366_s14  ;;  %s157_s21 = scalar_lea.vmem %s427_s2, %s351_s18 }
   0xf   : > { %v180_v1 = vld [vmem:[%s152_s17 + $0x10] sm:$0x1]  ;;  %v179_v2 = vld [vmem:[%s152_s17 + $0x8] sm:$0xff]  ;;  %v178_v3 = vld [vmem:[%s152_s17] sm:$0xff] }
  0x10   : > { %357 = vmatprep.subr.msk.mxu0 %vm188_vm0, %v180_v1 }
  0x11   : > { %358 = vmatpush3.msk.msra.mxu0 %vm188_vm0, %v180_v1 }
  0x12   : > { %170 = vbcast.lane.b32.xlu0 %v343_v0, 264  ;;  %359 = vmatprep.subr.mxu0 %v179_v2 }
  0x13   : > { %360 = vmatpush3.msra.mxu0 %v179_v2 }
  0x14   : > { %361 = vmatprep.subr.mxu0 %v178_v3 }
  0x15   : > { %362 = vmatpush3.msra.mxu0 %v178_v3 }
  0x80   : > { %v167_v6 = vpop.permute.xlu0 %166 }
  0x81   : > { %vm172_vm2 = vcmp.eq.s32.totalorder %v160_v5, %v167_v6 }
  0x82   : > { %v344_v8 = vsel %vm172_vm2, 1.0, %v384_v7 }
  0x83   : > { %363 = vmatprep.mubr.msk.f32.mxu0 %vm181_vm1, %v344_v8 }
  0x84   : > { %v171_v9 = vpop.permute.xlu0 %170 }
  0x85   : > { %vm173_vm3 = vcmp.eq.s32.totalorder %v160_v5, %v171_v9 }
  0x86   : > { %v345_v10 = vsel %vm173_vm3, 1.0, %v384_v7 }
  0x87   : > { %364 = vmatmul.mubr.msk.f32.vlgmr.msra.gmra.mxu0 %vm181_vm1, %v345_v10 }
 0x147   : > { %v365_v11 = vpop.f32.mrf.mxu0 }
 0x148   : > { %270 = vst.msk [vmem:[%s157_s21 + $0x8] sm:$0x1] %vm269_vm4, %v365_v11 }
 0x149   : > { %v258_v12 = vpop.f32.mrf.mxu0 }
 0x14a   : > { %268 = vst.msk [vmem:[%s157_s21] sm:$0xff] %vm267_vm5, %v258_v12 }
 0x14b PF: > { %s12_s9 = sadd.s32 1, %s382_s9  }
 0x14c   : > { %p9_p4 = scmp.ge.s32.totalorder %s12_s9, 4  }
 0x14e   :  { %11 = sbr.rel (!%p9_p4) target bundleno = 1 (0x1), region = 61 }

</bundles_post_ra>
